<compile_context>
chip_gen: v5e
topology: v5e:2x2
jax: 0.10.0
libtpu: 0.0.40
codegen_flags: <defaults>
</compile_context>

<pallas_src>
import math
import functools

import numpy as np
import jax
import jax.numpy as jnp
from jax.experimental import pallas as pl
from jax.experimental.pallas import tpu as pltpu


LANE = 128
SUBLANE = 8
VMEM_LIMIT = 48 * 1024 * 1024  # explicit, with headroom on v7x's 64 MiB


def _round_up(x, m):
    return ((x + m - 1) // m) * m


def _pick_tile(dim_pad, target):
    """Largest multiple of 128 that divides dim_pad and is <= target."""
    best = LANE
    t = LANE
    top = min(target, dim_pad)
    while t <= top:
        if dim_pad % t == 0:
            best = t
        t += LANE
    return best


# -----------------------------------------------------------------------------
# Kernel A: tiled matmul  h = x @ W   (f32 accumulation, arbitrary out dtype)
# -----------------------------------------------------------------------------
def _matmul_kernel(a_ref, b_ref, o_ref, acc_ref):
    @pl.when(pl.program_id(2) == 0)
    def _():
        acc_ref[...] = jnp.zeros_like(acc_ref)

    acc_ref[...] += jnp.dot(a_ref[...], b_ref[...],
                            preferred_element_type=jnp.float32)

    @pl.when(pl.program_id(2) == pl.num_programs(2) - 1)
    def _():
        o_ref[...] = acc_ref[...].astype(o_ref.dtype)


def pallas_matmul(a, b, out_dtype=jnp.float32, tm=256, tn=256, tk=512):
    m, k = a.shape
    k2, n = b.shape
    assert k == k2 and m % LANE == 0 and n % LANE == 0 and k % LANE == 0
    tm = _pick_tile(m, tm)
    tn = _pick_tile(n, tn)
    tk = _pick_tile(k, tk)
    grid = (m // tm, n // tn, k // tk)
    return pl.pallas_call(
        _matmul_kernel,
        out_shape=jax.ShapeDtypeStruct((m, n), out_dtype),
        grid=grid,
        in_specs=[pl.BlockSpec((tm, tk), lambda i, j, kk: (i, kk)),
                  pl.BlockSpec((tk, tn), lambda i, j, kk: (kk, j))],
        out_specs=pl.BlockSpec((tm, tn), lambda i, j, kk: (i, j)),
        scratch_shapes=[pltpu.VMEM((tm, tn), jnp.float32)],
        compiler_params=pltpu.CompilerParams(
            dimension_semantics=("parallel", "parallel", "arbitrary"),
            vmem_limit_bytes=VMEM_LIMIT),
    )(a, b)


# -----------------------------------------------------------------------------
# Kernel B: per-degree FiLM tables (tiny one-shot; hoisted out of the node grid)
#   gamma_tab[d] = relu(tanh(PE[d] @ U) @ W_gamma + b_gamma)
#   beta_tab[d]  = relu(tanh(PE[d] @ U) @ W_beta  + b_beta)
# -----------------------------------------------------------------------------
def _film_table_kernel(pe_ref, u_ref, wg_ref, wb_ref, bg_ref, bb_ref,
                       gam_ref, bet_ref):
    m = jnp.tanh(jnp.dot(pe_ref[...], u_ref[...],
                         preferred_element_type=jnp.float32))
    gam_ref[...] = jax.nn.relu(
        jnp.dot(m, wg_ref[...], preferred_element_type=jnp.float32) + bg_ref[...])
    bet_ref[...] = jax.nn.relu(
        jnp.dot(m, wb_ref[...], preferred_element_type=jnp.float32) + bb_ref[...])


def film_tables(pe_table, layer_params):
    n_deg, dim_d = pe_table.shape
    d = layer_params["W_gamma"].shape[1]
    n_deg_pad = _round_up(n_deg, SUBLANE)
    pe_pad = jnp.pad(pe_table, ((0, n_deg_pad - n_deg), (0, 0)))

    gam, bet = pl.pallas_call(
        _film_table_kernel,
        out_shape=(jax.ShapeDtypeStruct((n_deg_pad, d), jnp.float32),
                   jax.ShapeDtypeStruct((n_deg_pad, d), jnp.float32)),
        grid=(1,),
        in_specs=[pl.BlockSpec((n_deg_pad, dim_d), lambda i: (0, 0)),
                  pl.BlockSpec((dim_d, dim_d), lambda i: (0, 0)),
                  pl.BlockSpec((dim_d, d), lambda i: (0, 0)),
                  pl.BlockSpec((dim_d, d), lambda i: (0, 0)),
                  pl.BlockSpec((1, d), lambda i: (0, 0)),
                  pl.BlockSpec((1, d), lambda i: (0, 0))],
        out_specs=(pl.BlockSpec((n_deg_pad, d), lambda i: (0, 0)),
                   pl.BlockSpec((n_deg_pad, d), lambda i: (0, 0))),
        compiler_params=pltpu.CompilerParams(vmem_limit_bytes=VMEM_LIMIT),
    )(pe_pad, layer_params["U"], layer_params["W_gamma"],
      layer_params["W_beta"], layer_params["b_gamma"], layer_params["b_beta"])
    return gam[:n_deg], bet[:n_deg]


# -----------------------------------------------------------------------------
# Kernel C: K-tiled debiased GCN aggregation + FiLM epilogue + per-tile partial
#           regularizer sums.  Grid = (node-row tiles [parallel], node-col tiles
#           [arbitrary]).  gs/bs are sign-folded gamma/beta gathered per node.
# -----------------------------------------------------------------------------
def _debias_kernel(adj_ref, h_ref, gs_ref, bs_ref,
                   out_ref, bias_ref, film_ref, acc_ref, *, omega):
    k = pl.program_id(1)

    @pl.when(k == 0)
    def _():
        acc_ref[...] = jnp.zeros_like(acc_ref)

    acc_ref[...] += jnp.dot(adj_ref[...], h_ref[...],
                            preferred_element_type=jnp.float32)

    @pl.when(k == pl.num_programs(1) - 1)
    def _():
        agg = acc_ref[...]
        gs = gs_ref[...]
        bs = bs_ref[...]
        # sign-folded debias context: gs*agg + bs == (+/-1) * (gamma*agg + beta)
        b_ctx = gs * agg + bs
        out_ref[...] = agg + omega * b_ctx
        bias_ref[...] = jnp.full(bias_ref.shape, jnp.sum(b_ctx * b_ctx),
                                 dtype=jnp.float32)
        film_ref[...] = jnp.full(film_ref.shape,
                                 jnp.sum(gs * gs) + jnp.sum(bs * bs),
                                 dtype=jnp.float32)


def debias_layer(x_pad, adj_c, gs_nodes, bs_nodes, weight_pad, *,
                 omega, matmul_dtype, tile_rows):
    n_pad = x_pad.shape[0]
    d_pad = weight_pad.shape[1]

    # Feature transform (tiled MXU matmul), emitted in the compute dtype so the
    # aggregation stream is half-width.
    h = pallas_matmul(x_pad.astype(matmul_dtype),
                      weight_pad.astype(matmul_dtype),
                      out_dtype=matmul_dtype)

    tn = _pick_tile(n_pad, tile_rows)
    tk = tn                              # contraction tile over node columns
    grid = (n_pad // tn, n_pad // tk)

    # Dominant stream is adj; give it a deeper pipeline when the K loop is long
    # (graceful fallback if this JAX build lacks pipeline_mode).
    adj_spec = pl.BlockSpec((tn, tk), lambda i, k: (i, k))
    if grid[1] > 2:
        try:
            adj_spec = pl.BlockSpec((tn, tk), lambda i, k: (i, k),
                                    pipeline_mode=pl.Buffered(3))
        except (TypeError, AttributeError):
            pass

    kernel = functools.partial(_debias_kernel, omega=float(omega))

    out, bias_p, film_p = pl.pallas_call(
        kernel,
        out_shape=(jax.ShapeDtypeStruct((n_pad, d_pad), jnp.float32),
                   jax.ShapeDtypeStruct((grid[0], SUBLANE, LANE), jnp.float32),
                   jax.ShapeDtypeStruct((grid[0], SUBLANE, LANE), jnp.float32)),
        grid=grid,
        in_specs=[
            adj_spec,                                         # adj (tn, tk)
            pl.BlockSpec((tk, d_pad), lambda i, k: (k, 0)),   # h tile
            pl.BlockSpec((tn, d_pad), lambda i, k: (i, 0)),   # sign-folded gamma
            pl.BlockSpec((tn, d_pad), lambda i, k: (i, 0)),   # sign-folded beta
        ],
        out_specs=(
            pl.BlockSpec((tn, d_pad), lambda i, k: (i, 0)),
            pl.BlockSpec((1, SUBLANE, LANE), lambda i, k: (i, 0, 0)),
            pl.BlockSpec((1, SUBLANE, LANE), lambda i, k: (i, 0, 0)),
        ),
        scratch_shapes=[pltpu.VMEM((tn, d_pad), jnp.float32)],
        compiler_params=pltpu.CompilerParams(
            dimension_semantics=("parallel", "arbitrary"),
            vmem_limit_bytes=VMEM_LIMIT),
    )(adj_c, h, gs_nodes, bs_nodes)

    # Per-row-tile partial sums; reduced by the caller.
    return out, bias_p[:, 0, 0], film_p[:, 0, 0]


# -----------------------------------------------------------------------------
# DFair_GCN forward: two Debias_v2 layers, dropout (eval mode = identity),
# summed regularizers.
# -----------------------------------------------------------------------------
def dfair_gcn_forward(x, adj, deg, params, *, omega, k_ratio,
                      matmul_dtype=jnp.bfloat16, tile_rows=256):
    n, nfeat = x.shape
    d = params["layer1"]["weight"].shape[1]

    # Padded geometry: lane-dense feature dims, tile-aligned node dim.
    tn_target = min(tile_rows, _round_up(n, LANE))
    n_pad = _round_up(n, tn_target)
    f_pad = _round_up(nfeat, LANE)
    d_pad = _round_up(d, LANE)

    x_pad = jnp.pad(x, ((0, n_pad - n), (0, f_pad - nfeat)))
    adj_c = jnp.pad(adj, ((0, n_pad - n), (0, n_pad - n))).astype(matmul_dtype)

    w1_pad = jnp.pad(params["layer1"]["weight"],
                     ((0, f_pad - nfeat), (0, d_pad - d)))
    w2_pad = jnp.pad(params["layer2"]["weight"],
                     ((0, d_pad - d), (0, d_pad - d)))

    # Low/high-degree sign (+omega added / -omega removed), zero for pad rows.
    deg_f = deg.astype(jnp.float32)
    thr = k_ratio * jnp.mean(deg_f)
    sign = jnp.where(deg_f < thr, 1.0, -1.0).reshape(-1, 1)
    sign = jnp.pad(sign, ((0, n_pad - n), (0, 0)))
    deg_idx = jnp.pad(deg, (0, n_pad - n))

    def gather_film(layer_params):
        gam_tab, bet_tab = film_tables(params["pe_table"], layer_params)
        gam = jnp.pad(gam_tab[deg_idx], ((0, 0), (0, d_pad - d))) * sign
        bet = jnp.pad(bet_tab[deg_idx], ((0, 0), (0, d_pad - d))) * sign
        return gam, bet

    gs1, bs1 = gather_film(params["layer1"])
    gs2, bs2 = gather_film(params["layer2"])

    x1, b1p, f1p = debias_layer(x_pad, adj_c, gs1, bs1, w1_pad,
                                omega=omega, matmul_dtype=matmul_dtype,
                                tile_rows=tn_target)
    # F.dropout(..., training=False) -> identity.
    x2, b2p, f2p = debias_layer(x1, adj_c, gs2, bs2, w2_pad,
                                omega=omega, matmul_dtype=matmul_dtype,
                                tile_rows=tn_target)

    inv_n = 1.0 / float(n)
    bias_reg = (jnp.sum(b1p) + jnp.sum(b2p)) * inv_n
    film_reg = (jnp.sum(f1p) + jnp.sum(f2p)) * inv_n
    return x2[:n, :d], bias_reg, film_reg


# -----------------------------------------------------------------------------
# Deterministic parameter / input construction.
# -----------------------------------------------------------------------------
def sinusoidal_pe(d_max, dim_d):
    pos = np.arange(d_max + 1, dtype=np.float32)[:, None]
    div = np.exp(np.arange(0, dim_d, 2, dtype=np.float32) * -(math.log(10000.0) / dim_d))
    pe = np.zeros((d_max + 1, dim_d), dtype=np.float32)
    pe[:, 0::2] = np.sin(pos * div)
    pe[:, 1::2] = np.cos(pos * div)
    return jnp.asarray(pe)


def xavier_uniform(key, shape, gain=1.414):
    fan_in, fan_out = shape
    bound = gain * math.sqrt(6.0 / (fan_in + fan_out))
    return jax.random.uniform(key, shape, jnp.float32, -bound, bound)


def init_debias_params(key, in_dim, out_dim, dim_d):
    ks = jax.random.split(key, 6)
    return {
        "weight": xavier_uniform(ks[0], (in_dim, out_dim)),
        "W_gamma": xavier_uniform(ks[1], (dim_d, out_dim)),
        "W_beta": xavier_uniform(ks[2], (dim_d, out_dim)),
        "U": xavier_uniform(ks[3], (dim_d, dim_d)),
        "b_gamma": xavier_uniform(ks[4], (1, out_dim)),
        "b_beta": xavier_uniform(ks[5], (1, out_dim)),
    }


if __name__ == "__main__":
    key = jax.random.PRNGKey(0)
    N, nfeat, hidden, dim_d = 64, 32, 32, 16
    omega, k_ratio = 0.1, 1.0

    k_x, k_adj, k_p1, k_p2 = jax.random.split(key, 4)

    x = jax.random.normal(k_x, (N, nfeat), jnp.float32)

    # Random undirected graph; GCN-normalized dense adjacency; raw degrees d.
    up = jax.random.bernoulli(k_adj, 0.08, (N, N)).astype(jnp.float32)
    a = jnp.triu(up, k=1)
    a = a + a.T
    deg = jnp.sum(a, axis=1).astype(jnp.int32)
    a_hat = a + jnp.eye(N, dtype=jnp.float32)
    d_inv_sqrt = 1.0 / jnp.sqrt(jnp.sum(a_hat, axis=1))
    adj = a_hat * d_inv_sqrt[:, None] * d_inv_sqrt[None, :]

    max_degree = N
    params = {
        "layer1": init_debias_params(k_p1, nfeat, hidden, dim_d),
        "layer2": init_debias_params(k_p2, hidden, hidden, dim_d),
        "pe_table": sinusoidal_pe(max_degree, dim_d),
    }

    out, bias_reg, film_reg = dfair_gcn_forward(x, adj, deg, params,
                                                omega=omega, k_ratio=k_ratio)
    jax.block_until_ready((out, bias_reg, film_reg))
    assert out.shape == (N, hidden)
    assert jnp.isfinite(out).all() and jnp.isfinite(bias_reg) and jnp.isfinite(film_reg)
    print("KERNEL_OK")
</pallas_src>

<mosaic_0001>
module attributes {stable_mosaic.version = 11 : i64} {
  func.func @_film_table_kernel(%arg0: i32, %arg1: memref<72x16xf32, #tpu.memory_space<vmem>>, %arg2: memref<16x16xf32, #tpu.memory_space<vmem>>, %arg3: memref<16x32xf32, #tpu.memory_space<vmem>>, %arg4: memref<16x32xf32, #tpu.memory_space<vmem>>, %arg5: memref<1x32xf32, #tpu.memory_space<vmem>>, %arg6: memref<1x32xf32, #tpu.memory_space<vmem>>, %arg7: memref<72x32xf32, #tpu.memory_space<vmem>>, %arg8: memref<72x32xf32, #tpu.memory_space<vmem>>) attributes {dimension_semantics = [#tpu.dimension_semantics<arbitrary>], iteration_bounds = array<i64: 1>, scalar_prefetch = 0 : i64, scratch_operands = 0 : i64, tpu.core_type = #tpu.core_type<tc>, window_params = [{pipeline_mode = #tpu.pipeline_mode<synchronous>, transform_indices = @transform_0, window_bounds = array<i64: 72, 16>}, {pipeline_mode = #tpu.pipeline_mode<synchronous>, transform_indices = @transform_1, window_bounds = array<i64: 16, 16>}, {pipeline_mode = #tpu.pipeline_mode<synchronous>, transform_indices = @transform_2, window_bounds = array<i64: 16, 32>}, {pipeline_mode = #tpu.pipeline_mode<synchronous>, transform_indices = @transform_3, window_bounds = array<i64: 16, 32>}, {pipeline_mode = #tpu.pipeline_mode<synchronous>, transform_indices = @transform_4, window_bounds = array<i64: 1, 32>}, {pipeline_mode = #tpu.pipeline_mode<synchronous>, transform_indices = @transform_5, window_bounds = array<i64: 1, 32>}, {pipeline_mode = #tpu.pipeline_mode<synchronous>, transform_indices = @transform_6, window_bounds = array<i64: 72, 32>}, {pipeline_mode = #tpu.pipeline_mode<synchronous>, transform_indices = @transform_7, window_bounds = array<i64: 72, 32>}]} {
    %c0 = arith.constant 0 : index
    %c0_0 = arith.constant 0 : index
    %0 = vector.load %arg1[%c0, %c0_0] : memref<72x16xf32, #tpu.memory_space<vmem>>, vector<72x16xf32>
    %c0_1 = arith.constant 0 : index
    %c0_2 = arith.constant 0 : index
    %1 = vector.load %arg2[%c0_1, %c0_2] : memref<16x16xf32, #tpu.memory_space<vmem>>, vector<16x16xf32>
    %cst = arith.constant dense<0.000000e+00> : vector<72x16xf32>
    %2 = tpu.matmul %0, %1, %cst {dimension_numbers = #tpu.dot_dimension_numbers<[1], [0], [0], [1], [0, 0, 1, 1], [], []>} : vector<72x16xf32>, vector<16x16xf32>, vector<72x16xf32> -> vector<72x16xf32>
    %3 = math.tanh %2 : vector<72x16xf32>
    %c0_3 = arith.constant 0 : index
    %c0_4 = arith.constant 0 : index
    %4 = vector.load %arg3[%c0_3, %c0_4] : memref<16x32xf32, #tpu.memory_space<vmem>>, vector<16x32xf32>
    %cst_5 = arith.constant dense<0.000000e+00> : vector<72x32xf32>
    %5 = tpu.matmul %3, %4, %cst_5 {dimension_numbers = #tpu.dot_dimension_numbers<[1], [0], [0], [1], [0, 0, 1, 1], [], []>} : vector<72x16xf32>, vector<16x32xf32>, vector<72x32xf32> -> vector<72x32xf32>
    %c0_6 = arith.constant 0 : index
    %c0_7 = arith.constant 0 : index
    %6 = vector.load %arg5[%c0_6, %c0_7] : memref<1x32xf32, #tpu.memory_space<vmem>>, vector<1x32xf32>
    %7 = vector.broadcast %6 : vector<1x32xf32> to vector<72x32xf32>
    %8 = arith.addf %5, %7 : vector<72x32xf32>
    %cst_8 = arith.constant 0.000000e+00 : f32
    %9 = vector.broadcast %cst_8 : f32 to vector<72x32xf32>
    %10 = arith.maximumf %8, %9 : vector<72x32xf32>
    %c0_9 = arith.constant 0 : index
    %c0_10 = arith.constant 0 : index
    %11 = vector.load %arg7[%c0_9, %c0_10] : memref<72x32xf32, #tpu.memory_space<vmem>>, vector<72x32xf32>
    tpu.vector_store %arg7[%c0_9, %c0_10], %10 {strides = array<i32>} : memref<72x32xf32, #tpu.memory_space<vmem>>, vector<72x32xf32>,
    %c0_11 = arith.constant 0 : index
    %c0_12 = arith.constant 0 : index
    %12 = vector.load %arg4[%c0_11, %c0_12] : memref<16x32xf32, #tpu.memory_space<vmem>>, vector<16x32xf32>
    %cst_13 = arith.constant dense<0.000000e+00> : vector<72x32xf32>
    %13 = tpu.matmul %3, %12, %cst_13 {dimension_numbers = #tpu.dot_dimension_numbers<[1], [0], [0], [1], [0, 0, 1, 1], [], []>} : vector<72x16xf32>, vector<16x32xf32>, vector<72x32xf32> -> vector<72x32xf32>
    %c0_14 = arith.constant 0 : index
    %c0_15 = arith.constant 0 : index
    %14 = vector.load %arg6[%c0_14, %c0_15] : memref<1x32xf32, #tpu.memory_space<vmem>>, vector<1x32xf32>
    %15 = vector.broadcast %14 : vector<1x32xf32> to vector<72x32xf32>
    %16 = arith.addf %13, %15 : vector<72x32xf32>
    %cst_16 = arith.constant 0.000000e+00 : f32
    %17 = vector.broadcast %cst_16 : f32 to vector<72x32xf32>
    %18 = arith.maximumf %16, %17 : vector<72x32xf32>
    %c0_17 = arith.constant 0 : index
    %c0_18 = arith.constant 0 : index
    %19 = vector.load %arg8[%c0_17, %c0_18] : memref<72x32xf32, #tpu.memory_space<vmem>>, vector<72x32xf32>
    tpu.vector_store %arg8[%c0_17, %c0_18], %18 {strides = array<i32>} : memref<72x32xf32, #tpu.memory_space<vmem>>, vector<72x32xf32>,
    return
  }
  func.func @transform_0(%arg0: i32) -> (i32, i32) {
    %c0_i32 = arith.constant 0 : i32
    %c0_i32_0 = arith.constant 0 : i32
    %c0_i32_1 = arith.constant 0 : i32
    return %c0_i32, %c0_i32_0 : i32, i32
  }
  func.func @transform_1(%arg0: i32) -> (i32, i32) {
    %c0_i32 = arith.constant 0 : i32
    %c0_i32_0 = arith.constant 0 : i32
    %c0_i32_1 = arith.constant 0 : i32
    return %c0_i32, %c0_i32_0 : i32, i32
  }
  func.func @transform_2(%arg0: i32) -> (i32, i32) {
    %c0_i32 = arith.constant 0 : i32
    %c0_i32_0 = arith.constant 0 : i32
    %c0_i32_1 = arith.constant 0 : i32
    return %c0_i32, %c0_i32_0 : i32, i32
  }
  func.func @transform_3(%arg0: i32) -> (i32, i32) {
    %c0_i32 = arith.constant 0 : i32
    %c0_i32_0 = arith.constant 0 : i32
    %c0_i32_1 = arith.constant 0 : i32
    return %c0_i32, %c0_i32_0 : i32, i32
  }
  func.func @transform_4(%arg0: i32) -> (i32, i32) {
    %c0_i32 = arith.constant 0 : i32
    %c0_i32_0 = arith.constant 0 : i32
    %c0_i32_1 = arith.constant 0 : i32
    return %c0_i32, %c0_i32_0 : i32, i32
  }
  func.func @transform_5(%arg0: i32) -> (i32, i32) {
    %c0_i32 = arith.constant 0 : i32
    %c0_i32_0 = arith.constant 0 : i32
    %c0_i32_1 = arith.constant 0 : i32
    return %c0_i32, %c0_i32_0 : i32, i32
  }
  func.func @transform_6(%arg0: i32) -> (i32, i32) {
    %c0_i32 = arith.constant 0 : i32
    %c0_i32_0 = arith.constant 0 : i32
    %c0_i32_1 = arith.constant 0 : i32
    return %c0_i32, %c0_i32_0 : i32, i32
  }
  func.func @transform_7(%arg0: i32) -> (i32, i32) {
    %c0_i32 = arith.constant 0 : i32
    %c0_i32_0 = arith.constant 0 : i32
    %c0_i32_1 = arith.constant 0 : i32
    return %c0_i32, %c0_i32_0 : i32, i32
  }
}

</mosaic_0001>

<bundles_post_ra>
// kernel: tpu_custom_call.1
= control target key start
LH: loop header
LB: loop body
LE: loop exit
PB: predicated region body
PF: predicated region fallthrough
CT: control target
= control target key end

     0   :  { %vm36_vm0 = vcmask 130048   ;;  %vm203_vm1 = vcmask 261120   ;;  %s554_s1 = inlined_call_operand.vmem [shape: f32[16,16], index: 1, kind: input, shape index: {}]   ;;  %s555_s0 = inlined_call_operand.vmem [shape: f32[72,16], index: 0, kind: input, shape index: {}]   ;;  %s556_s4 = inlined_call_operand.vmem [shape: f32[1,32], index: 4, kind: input, shape index: {}]   ;;  %s557_s2 = inlined_call_operand.vmem [shape: f32[16,32], index: 2, kind: input, shape index: {}]   ;;  %s558_s3 = inlined_call_operand.vmem [shape: f32[16,32], index: 3, kind: input, shape index: {}]   ;;  %s559_s5 = inlined_call_operand.vmem [shape: f32[1,32], index: 5, kind: input, shape index: {}]   ;;  %s560_s6 = inlined_call_operand.vmem [shape: f32[72,32], index: 6, kind: output, shape index: {0}]   ;;  %s561_s7 = inlined_call_operand.vmem [shape: f32[72,32], index: 7, kind: output, shape index: {1}]  }
   0x1   :  { %v35_v0 = vld [vmem:[%s554_s1 + $0x8] sm:$0xff]  ;;  %v34_v1 = vld [vmem:[%s554_s1] sm:$0xff]  ;;  %v32_v3 = vld [vmem:[%s555_s0 + $0x38] sm:$0xff] }
   0x2   :  { %78 = vmatpush.msra.mxu0 %v35_v0  ;;  %316 = vmatpush.msra.mxu3 %v35_v0  ;;  %v25_v2 = vld [vmem:[%s555_s0] sm:$0xff]  ;;  %v26_v4 = vld [vmem:[%s555_s0 + $0x8] sm:$0xff]  ;;  %v27_v6 = vld [vmem:[%s555_s0 + $0x10] sm:$0xff] }
   0x3   :  { %v33_v5 = vld [vmem:[%s555_s0 + $0x40] sm:$0xff]  ;;  %v28_v7 = vld [vmem:[%s555_s0 + $0x18] sm:$0xff]  ;;  %v30_v9 = vld [vmem:[%s555_s0 + $0x28] sm:$0xff] }
   0x4   :  { %79 = vmatpush.msra.mxu0 %v34_v1  ;;  %317 = vmatpush.msra.mxu3 %v34_v1  ;;  %v29_v8 = vld [vmem:[%s555_s0 + $0x20] sm:$0xff]  ;;  %v31_v10 = vld [vmem:[%s555_s0 + $0x30] sm:$0xff]  ;;  %v118_v11 = vld [vmem:[%s557_s2 + $0x8] sm:$0xff] }
   0x5   :  { %289 = vmatmul.msk.f32.vlgmr.msra.gmra.mxu0 %vm36_vm0, %v25_v2  ;;  %296 = vmatmul.msk.f32.vlgmr.msra.gmra.mxu3 %vm36_vm0, %v32_v3  ;;  %v214_v12 = vld [vmem:[%s558_s3 + $0x8] sm:$0xff]  ;;  %v117_v13 = vld [vmem:[%s557_s2] sm:$0xff] }
   0x6   :  { %164 = vmatpush.msra.mxu1 %v118_v11  ;;  %233 = vmatpush.msra.mxu2 %v214_v12  ;;  %v213_v14 = vld [vmem:[%s558_s3] sm:$0xff] }
   0x7   :  { %318 = vmatpush.msrb.mxu3 %v118_v11  ;;  %v457_v33 = vld [vmem:[%s556_s4] ss:$0 sm:$0xff] }
   0x8   :  { %165 = vmatpush.msra.mxu1 %v117_v13  ;;  %234 = vmatpush.msra.mxu2 %v213_v14  ;;  %v463_v37 = vld [vmem:[%s559_s5] ss:$0 sm:$0xff] }
   0x9   :  { %319 = vmatpush.msrb.mxu3 %v117_v13 }
   0xb   :  { %320 = vmatpush.msra.mxu3 %v214_v12 }
   0xd   :  { %290 = vmatmul.msk.f32.gmra.mxu0 %vm36_vm0, %v26_v4  ;;  %297 = vmatmul.msk.f32.gmra.mxu3 %vm36_vm0, %v33_v5 }
   0xe   :  { %321 = vmatpush.msra.mxu3 %v213_v14 }
  0x15   :  { %291 = vmatmul.msk.f32.gmra.mxu0 %vm36_vm0, %v27_v6 }
  0x1d   :  { %292 = vmatmul.msk.f32.gmra.mxu0 %vm36_vm0, %v28_v7 }
  0x25   :  { %293 = vmatmul.msk.f32.gmra.mxu0 %vm36_vm0, %v29_v8 }
  0x2d   :  { %294 = vmatmul.msk.f32.gmra.mxu0 %vm36_vm0, %v30_v9 }
  0x35   :  { %295 = vmatmul.msk.f32.gmra.mxu0 %vm36_vm0, %v31_v10 }
  0x82   :  { %v81_v15 = vpop.f32.mrf.mxu0 }
  0x83   :  { %324 = vtanh.f32 %v81_v15 }
  0x88   :  { %v102_v16 = vpop.f32.mrf.mxu3 }
  0x89   :  { %v325_v17 = vpop.eup %324  ;;  %326 = vtanh.f32 %v102_v16 }
  0x8a   :  { %v84_v18 = vpop.f32.mrf.mxu0  ;;  %298 = vmatmul.msk.f32.vlgmr.msra.gmra.mxu1 %vm36_vm0, %v325_v17  ;;  %307 = vmatmul.msk.f32.vlgmr.msra.gmra.mxu2 %vm36_vm0, %v325_v17 }
  0x8b   :  { %328 = vtanh.f32 %v84_v18 }
  0x8f   :  { %v327_v19 = vpop.eup %326 }
  0x90   :  { %v105_v20 = vpop.f32.mrf.mxu3  ;;  %305 = vmatmul.msk.f32.vlgmr.msrb.gmra.mxu3 %vm36_vm0, %v327_v19 }
  0x91   :  { %v329_v21 = vpop.eup %328  ;;  %330 = vtanh.f32 %v105_v20 }
  0x92   :  { %v87_v22 = vpop.f32.mrf.mxu0  ;;  %299 = vmatmul.msk.f32.gmra.mxu1 %vm36_vm0, %v329_v21  ;;  %308 = vmatmul.msk.f32.gmra.mxu2 %vm36_vm0, %v329_v21 }
  0x93   :  { %332 = vtanh.f32 %v87_v22 }
  0x97   :  { %v331_v23 = vpop.eup %330 }
  0x98   :  { %306 = vmatmul.msk.f32.gmra.mxu3 %vm36_vm0, %v331_v23 }
  0x99   :  { %v333_v24 = vpop.eup %332 }
  0x9a   :  { %v90_v25 = vpop.f32.mrf.mxu0  ;;  %300 = vmatmul.msk.f32.gmra.mxu1 %vm36_vm0, %v333_v24  ;;  %309 = vmatmul.msk.f32.gmra.mxu2 %vm36_vm0, %v333_v24 }
  0x9b   :  { %334 = vtanh.f32 %v90_v25 }
  0xa0   :  { %314 = vmatmul.msk.f32.vlgmr.msra.gmra.mxu3 %vm36_vm0, %v327_v19 }
  0xa1   :  { %v335_v26 = vpop.eup %334 }
  0xa2   :  { %v93_v27 = vpop.f32.mrf.mxu0  ;;  %301 = vmatmul.msk.f32.gmra.mxu1 %vm36_vm0, %v335_v26  ;;  %310 = vmatmul.msk.f32.gmra.mxu2 %vm36_vm0, %v335_v26 }
  0xa3   :  { %336 = vtanh.f32 %v93_v27 }
  0xa8   :  { %315 = vmatmul.msk.f32.gmra.mxu3 %vm36_vm0, %v331_v23 }
  0xa9   :  { %v337_v28 = vpop.eup %336 }
  0xaa   :  { %v96_v29 = vpop.f32.mrf.mxu0  ;;  %302 = vmatmul.msk.f32.gmra.mxu1 %vm36_vm0, %v337_v28  ;;  %311 = vmatmul.msk.f32.gmra.mxu2 %vm36_vm0, %v337_v28 }
  0xab   :  { %338 = vtanh.f32 %v96_v29 }
  0xb1   :  { %v339_v30 = vpop.eup %338 }
  0xb2   :  { %v99_v31 = vpop.f32.mrf.mxu0  ;;  %303 = vmatmul.msk.f32.gmra.mxu1 %vm36_vm0, %v339_v30  ;;  %312 = vmatmul.msk.f32.gmra.mxu2 %vm36_vm0, %v339_v30 }
  0xb3   :  { %340 = vtanh.f32 %v99_v31 }
  0xb9   :  { %v341_v32 = vpop.eup %340 }
  0xba   :  { %304 = vmatmul.msk.f32.gmra.mxu1 %vm36_vm0, %v341_v32  ;;  %313 = vmatmul.msk.f32.gmra.mxu2 %vm36_vm0, %v341_v32 }
 0x107   :  { %v167_v34 = vpop.f32.mrf.mxu1 }
 0x108   :  { %v168_v35 = vadd.f32 %v457_v33, %v167_v34 }
 0x10a   :  { %v194_v36 = vmax.f32 %v168_v35, 0.0 }
 0x10c   :  { %204 = vst.msk [vmem:[%s560_s6] sm:$0xff] %vm203_vm1, %v194_v36 }
 0x10d   :  { %v236_v38 = vpop.f32.mrf.mxu2 }
 0x10e   :  { %v237_v39 = vadd.f32 %v463_v37, %v236_v38 }
 0x10f   :  { %v170_v40 = vpop.f32.mrf.mxu1 }
 0x110   :  { %v263_v41 = vmax.f32 %v237_v39, 0.0  ;;  %v171_v42 = vadd.f32 %v457_v33, %v170_v40 }
 0x112   :  { %272 = vst.msk [vmem:[%s561_s7] sm:$0xff] %vm203_vm1, %v263_v41  ;;  %v195_v43 = vmax.f32 %v171_v42, 0.0 }
 0x113   :  { %v188_v44 = vpop.f32.mrf.mxu3 }
 0x114   :  { %205 = vst.msk [vmem:[%s560_s6 + $0x8] sm:$0xff] %vm203_vm1, %v195_v43  ;;  %v189_v45 = vadd.f32 %v457_v33, %v188_v44 }
 0x115   :  { %v239_v46 = vpop.f32.mrf.mxu2 }
 0x116   :  { %v201_v47 = vmax.f32 %v189_v45, 0.0  ;;  %v240_v48 = vadd.f32 %v463_v37, %v239_v46 }
 0x117   :  { %v173_v49 = vpop.f32.mrf.mxu1 }
 0x118   :  { %211 = vst.msk [vmem:[%s560_s6 + $0x38] sm:$0xff] %vm203_vm1, %v201_v47  ;;  %v264_v50 = vmax.f32 %v240_v48, 0.0  ;;  %v174_v51 = vadd.f32 %v457_v33, %v173_v49 }
 0x11a   :  { %273 = vst.msk [vmem:[%s561_s7 + $0x8] sm:$0xff] %vm203_vm1, %v264_v50  ;;  %v196_v52 = vmax.f32 %v174_v51, 0.0 }
 0x11b   :  { %v191_v53 = vpop.f32.mrf.mxu3 }
 0x11c   :  { %206 = vst.msk [vmem:[%s560_s6 + $0x10] sm:$0xff] %vm203_vm1, %v196_v52  ;;  %v192_v54 = vadd.f32 %v457_v33, %v191_v53 }
 0x11d   :  { %v242_v55 = vpop.f32.mrf.mxu2 }
 0x11e   :  { %v202_v56 = vmax.f32 %v192_v54, 0.0  ;;  %v243_v57 = vadd.f32 %v463_v37, %v242_v55 }
 0x11f   :  { %v176_v58 = vpop.f32.mrf.mxu1 }
 0x120   :  { %212 = vst.msk [vmem:[%s560_s6 + $0x40] sm:$0xff] %vm203_vm1, %v202_v56  ;;  %v265_v59 = vmax.f32 %v243_v57, 0.0  ;;  %v177_v60 = vadd.f32 %v457_v33, %v176_v58 }
 0x122   :  { %274 = vst.msk [vmem:[%s561_s7 + $0x10] sm:$0xff] %vm203_vm1, %v265_v59  ;;  %v197_v61 = vmax.f32 %v177_v60, 0.0 }
 0x123   :  { %v257_v62 = vpop.f32.mrf.mxu3 }
 0x124   :  { %207 = vst.msk [vmem:[%s560_s6 + $0x18] sm:$0xff] %vm203_vm1, %v197_v61  ;;  %v258_v63 = vadd.f32 %v463_v37, %v257_v62 }
 0x125   :  { %v245_v0 = vpop.f32.mrf.mxu2 }
 0x126   :  { %v246_v1 = vadd.f32 %v463_v37, %v245_v0  ;;  %v270_v2 = vmax.f32 %v258_v63, 0.0 }
 0x127   :  { %v179_v3 = vpop.f32.mrf.mxu1 }
 0x128   :  { %v266_v4 = vmax.f32 %v246_v1, 0.0  ;;  %279 = vst.msk [vmem:[%s561_s7 + $0x38] sm:$0xff] %vm203_vm1, %v270_v2  ;;  %v180_v5 = vadd.f32 %v457_v33, %v179_v3 }
 0x12a   :  { %275 = vst.msk [vmem:[%s561_s7 + $0x18] sm:$0xff] %vm203_vm1, %v266_v4  ;;  %v198_v6 = vmax.f32 %v180_v5, 0.0 }
 0x12b   :  { %v260_v7 = vpop.f32.mrf.mxu3 }
 0x12c   :  { %208 = vst.msk [vmem:[%s560_s6 + $0x20] sm:$0xff] %vm203_vm1, %v198_v6  ;;  %v261_v8 = vadd.f32 %v463_v37, %v260_v7 }
 0x12d   :  { %v248_v9 = vpop.f32.mrf.mxu2 }
 0x12e   :  { %v249_v10 = vadd.f32 %v463_v37, %v248_v9  ;;  %v271_v11 = vmax.f32 %v261_v8, 0.0 }
 0x12f   :  { %v182_v12 = vpop.f32.mrf.mxu1 }
 0x130   :  { %v267_v13 = vmax.f32 %v249_v10, 0.0  ;;  %280 = vst.msk [vmem:[%s561_s7 + $0x40] sm:$0xff] %vm203_vm1, %v271_v11  ;;  %v183_v14 = vadd.f32 %v457_v33, %v182_v12 }
 0x132   :  { %276 = vst.msk [vmem:[%s561_s7 + $0x20] sm:$0xff] %vm203_vm1, %v267_v13  ;;  %v199_v15 = vmax.f32 %v183_v14, 0.0 }
 0x134   :  { %209 = vst.msk [vmem:[%s560_s6 + $0x28] sm:$0xff] %vm203_vm1, %v199_v15 }
 0x135   :  { %v251_v16 = vpop.f32.mrf.mxu2 }
 0x136   :  { %v252_v17 = vadd.f32 %v463_v37, %v251_v16 }
 0x137   :  { %v185_v18 = vpop.f32.mrf.mxu1 }
 0x138   :  { %v268_v19 = vmax.f32 %v252_v17, 0.0  ;;  %v186_v20 = vadd.f32 %v457_v33, %v185_v18 }
 0x13a   :  { %277 = vst.msk [vmem:[%s561_s7 + $0x28] sm:$0xff] %vm203_vm1, %v268_v19  ;;  %v200_v21 = vmax.f32 %v186_v20, 0.0 }
 0x13c   :  { %210 = vst.msk [vmem:[%s560_s6 + $0x30] sm:$0xff] %vm203_vm1, %v200_v21 }
 0x13d   :  { %v254_v22 = vpop.f32.mrf.mxu2 }
 0x13e   :  { %v255_v23 = vadd.f32 %v463_v37, %v254_v22 }
 0x140   :  { %v269_v24 = vmax.f32 %v255_v23, 0.0 }
 0x142   :  { %278 = vst.msk [vmem:[%s561_s7 + $0x30] sm:$0xff] %vm203_vm1, %v269_v24 }

</bundles_post_ra>
